<compile_context>
chip_gen: v7x
topology: tpu7x:2x2x1
jax: 0.10.0
libtpu: 0.0.40
codegen_flags: <defaults>
</compile_context>

<pallas_src>
import jax
import jax.numpy as jnp
from jax.experimental import pallas as pl
from jax.experimental.pallas import tpu as pltpu


_WEIGHT_RESIDENT_BYTES = 8 * 1024 * 1024    # keep full weight in VMEM below this
_VMEM_BUDGET_BYTES = 24 * 1024 * 1024       # double-buffered working-set target


def _round_up(a, b):
    return ((a + b - 1) // b) * b


def _patch_embed_kernel(patches_ref, w_ref, scale_ref, shift_ref, o_ref):
    # patches_ref: (tm, K)   w_ref: (K, tn)   scale/shift: (1, tn) f32
    # o_ref: (tm, tn) out_dtype
    acc = jnp.dot(patches_ref[...], w_ref[...],
                  preferred_element_type=jnp.float32)
    y = acc * scale_ref[...] + shift_ref[...]
    o_ref[...] = jnp.maximum(y, 0.0).astype(o_ref.dtype)


def patch_embed_forward(x, conv_w, bn_gamma, bn_beta, bn_mean, bn_var,
                        patch_size=4, eps=1e-5, tm=None, tn=None,
                        operand_dtype=jnp.bfloat16, out_dtype=jnp.float32,
                        channels_last=False):
    """x: (B, C, H, W) NCHW.  conv_w: (E, C, p, p).

    Returns (B, E, H/p, W/p) by default (PyTorch NCHW semantics) or
    (B, H/p, W/p, E) when channels_last=True (skips the output transpose).
    """
    B, C, H, W = x.shape
    E = conv_w.shape[0]
    p = patch_size
    assert H % p == 0 and W % p == 0
    Hp, Wp = H // p, W // p

    M = B * Hp * Wp
    K = C * p * p

    in_itemsize = jnp.dtype(operand_dtype).itemsize
    out_itemsize = jnp.dtype(out_dtype).itemsize

    # ---- E tiling ------------------------------------------------------------
    # Prefer a single E tile (weight fully VMEM-resident, DMA'd exactly once).
    if tn is None:
        if K * E * in_itemsize <= _WEIGHT_RESIDENT_BYTES:
            tn, E_pad = E, E
        else:
            E_pad = _round_up(E, 128)
            tn = min(512, E_pad)
            while E_pad % tn:
                tn -= 128
    else:
        if tn >= E:
            tn, E_pad = E, E
        else:
            E_pad = _round_up(E, 128)
            tn = max(128, _round_up(int(tn), 128))
            while E_pad % tn:
                tn -= 128
    single_e_tile = (tn == E_pad)

    # ---- M tiling ------------------------------------------------------------
    if tm is None:
        tm = 1024
    tm = max(16, (int(tm) // 16) * 16)

    def _vmem_footprint(tm_):
        return (2 * tm_ * K * in_itemsize       # patches (double-buffered)
                + 2 * K * tn * in_itemsize      # weight
                + 4 * tn * 4                    # scale + shift
                + 2 * tm_ * tn * out_itemsize)  # output (double-buffered)

    while _vmem_footprint(tm) > _VMEM_BUDGET_BYTES and tm > 64:
        tm = max(64, (tm // 2 // 16) * 16)

    if M <= tm:
        tm = _round_up(M, 16)
        M_pad = tm
    else:
        M_pad = _round_up(M, tm)
        if M_pad != M:
            # Prefer a slightly smaller tile that divides M exactly (keeps the
            # post-kernel slice a no-op) over padding, down to tm // 2.
            for cand in range(tm - 16, max(16, tm // 2) - 1, -16):
                if M % cand == 0:
                    tm, M_pad = cand, M
                    break

    # ---- glue (plain JAX): patch extraction + weight flatten + BN fold -------
    # (B, C, Hp, p, Wp, p) -> (B, Hp, Wp, C, p, p) -> (M, K).  allow_input_fusion
    # lets XLA fuse this transpose/pad/cast chain into the kernel's input DMA.
    patches = x.reshape(B, C, Hp, p, Wp, p).transpose(0, 2, 4, 1, 3, 5)
    patches = patches.reshape(M, K)
    if M_pad != M:
        patches = jnp.pad(patches, ((0, M_pad - M), (0, 0)))
    patches = patches.astype(operand_dtype)

    w2d = conv_w.reshape(E, K).T                                  # (K, E)
    if E_pad != E:
        w2d = jnp.pad(w2d, ((0, 0), (0, E_pad - E)))
    w2d = w2d.astype(operand_dtype)

    # fold eval-mode BatchNorm into per-channel scale/shift (kept in f32)
    inv_std = 1.0 / jnp.sqrt(bn_var.astype(jnp.float32) + eps)
    scale = bn_gamma.astype(jnp.float32) * inv_std
    shift = bn_beta.astype(jnp.float32) - bn_mean.astype(jnp.float32) * scale
    if E_pad != E:
        scale = jnp.pad(scale, (0, E_pad - E))
        shift = jnp.pad(shift, (0, E_pad - E))
    scale = scale.reshape(1, E_pad)
    shift = shift.reshape(1, E_pad)

    m_tiles = M_pad // tm
    e_tiles = E_pad // tn

    if single_e_tile:
        # 1-D grid over M: weight / scale / shift are revisited (same block
        # index every step) -> DMA'd once, fully VMEM-resident.
        grid = (m_tiles,)
        in_specs = [
            pl.BlockSpec((tm, K), lambda i: (i, 0)),
            pl.BlockSpec((K, tn), lambda i: (0, 0)),
            pl.BlockSpec((1, tn), lambda i: (0, 0)),
            pl.BlockSpec((1, tn), lambda i: (0, 0)),
        ]
        out_spec = pl.BlockSpec((tm, tn), lambda i: (i, 0))
        dim_sem = ("parallel",)
        patches_passes = 1
    else:
        # 2-D grid, E outer / M inner: weight block changes only with the outer
        # index, so it streams once per E tile (never once per M tile).
        grid = (e_tiles, m_tiles)
        in_specs = [
            pl.BlockSpec((tm, K), lambda j, i: (i, 0)),
            pl.BlockSpec((K, tn), lambda j, i: (0, j)),
            pl.BlockSpec((1, tn), lambda j, i: (0, j)),
            pl.BlockSpec((1, tn), lambda j, i: (0, j)),
        ]
        out_spec = pl.BlockSpec((tm, tn), lambda j, i: (i, j))
        dim_sem = ("parallel", "parallel")
        patches_passes = e_tiles

    cost = pl.CostEstimate(
        flops=2 * M * K * E,
        transcendentals=0,
        bytes_accessed=(patches_passes * M_pad * K * in_itemsize   # patches
                        + K * E_pad * in_itemsize                  # weight (once)
                        + 2 * E_pad * 4                            # scale + shift
                        + M_pad * E_pad * out_itemsize),           # output
    )

    vmem_limit = int(min(56 * 1024 * 1024,
                         max(32 * 1024 * 1024,
                             _vmem_footprint(tm) + 16 * 1024 * 1024)))

    out_flat = pl.pallas_call(
        _patch_embed_kernel,
        out_shape=jax.ShapeDtypeStruct((M_pad, E_pad), out_dtype),
        grid_spec=pltpu.PrefetchScalarGridSpec(
            num_scalar_prefetch=0,
            grid=grid,
            in_specs=in_specs,
            out_specs=out_spec,
        ),
        compiler_params=pltpu.CompilerParams(
            dimension_semantics=dim_sem,
            allow_input_fusion=[True, False, False, False],
            vmem_limit_bytes=vmem_limit,
        ),
        cost_estimate=cost,
    )(patches, w2d, scale, shift)

    if M_pad != M or E_pad != E:
        out_flat = out_flat[:M, :E]
    out = out_flat.reshape(B, Hp, Wp, E)                 # channels-last / tokens
    if channels_last:
        return out                                       # (B, Hp, Wp, E)
    return out.transpose(0, 3, 1, 2)                     # PyTorch NCHW


if __name__ == "__main__":
    # small, deterministic example consistent with the module defaults
    B, C, H, W = 2, 4, 16, 16
    E, p = 64, 4

    key = jax.random.PRNGKey(0)
    kx, kw, kg, kb, km, kv = jax.random.split(key, 6)

    x = jax.random.normal(kx, (B, C, H, W), dtype=jnp.float32)
    conv_w = jax.random.normal(kw, (E, C, p, p), dtype=jnp.float32) * 0.1
    bn_gamma = 1.0 + 0.1 * jax.random.normal(kg, (E,), dtype=jnp.float32)
    bn_beta = 0.1 * jax.random.normal(kb, (E,), dtype=jnp.float32)
    bn_mean = 0.1 * jax.random.normal(km, (E,), dtype=jnp.float32)
    bn_var = 0.5 + jnp.abs(jax.random.normal(kv, (E,), dtype=jnp.float32))

    # tm=16 exercises a multi-step grid even at this tiny size (M = 32 patches,
    # 16 divides 32 so no M padding and no post-kernel slice copy)
    out = patch_embed_forward(x, conv_w, bn_gamma, bn_beta, bn_mean, bn_var,
                              patch_size=p, tm=16)
    out = jax.block_until_ready(out)

    # sanity check vs pure-JAX f32 reference (kernel uses bf16 operands with
    # f32 accumulation -> loose tolerance)
    patches_ref = x.reshape(B, C, H // p, p, W // p, p).transpose(0, 2, 4, 1, 3, 5)
    patches_ref = patches_ref.reshape(B * (H // p) * (W // p), C * p * p)
    ref = patches_ref @ conv_w.reshape(E, -1).T
    ref = (ref - bn_mean) / jnp.sqrt(bn_var + 1e-5) * bn_gamma + bn_beta
    ref = jnp.maximum(ref, 0.0).reshape(B, H // p, W // p, E).transpose(0, 3, 1, 2)

    assert out.shape == (B, E, H // p, W // p)
    assert jnp.allclose(out, ref, atol=5e-2, rtol=5e-2), \
        float(jnp.max(jnp.abs(out - ref)))

    print("KERNEL_OK")
</pallas_src>

<mosaic_0001>
module attributes {stable_mosaic.version = 11 : i64} {
  func.func @_patch_embed_kernel(%arg0: i32, %arg1: memref<16x64xbf16, #tpu.memory_space<vmem>>, %arg2: memref<64x64xbf16, #tpu.memory_space<vmem>>, %arg3: memref<1x64xf32, #tpu.memory_space<vmem>>, %arg4: memref<1x64xf32, #tpu.memory_space<vmem>>, %arg5: memref<16x64xf32, #tpu.memory_space<vmem>>) attributes {dimension_semantics = [#tpu.dimension_semantics<parallel>], iteration_bounds = array<i64: 2>, scalar_prefetch = 0 : i64, scratch_operands = 0 : i64, tpu.core_type = #tpu.core_type<tc>, window_params = [{transform_indices = @transform_0, window_bounds = array<i64: 16, 64>}, {pipeline_mode = #tpu.pipeline_mode<synchronous>, transform_indices = @transform_1, window_bounds = array<i64: 64, 64>}, {pipeline_mode = #tpu.pipeline_mode<synchronous>, transform_indices = @transform_2, window_bounds = array<i64: 1, 64>}, {pipeline_mode = #tpu.pipeline_mode<synchronous>, transform_indices = @transform_3, window_bounds = array<i64: 1, 64>}, {transform_indices = @transform_4, window_bounds = array<i64: 16, 64>}]} {
    %c0 = arith.constant 0 : index
    %c0_0 = arith.constant 0 : index
    %0 = vector.load %arg1[%c0, %c0_0] : memref<16x64xbf16, #tpu.memory_space<vmem>>, vector<16x64xbf16>
    %c0_1 = arith.constant 0 : index
    %c0_2 = arith.constant 0 : index
    %1 = vector.load %arg2[%c0_1, %c0_2] : memref<64x64xbf16, #tpu.memory_space<vmem>>, vector<64x64xbf16>
    %cst = arith.constant dense<0.000000e+00> : vector<16x64xf32>
    %2 = tpu.matmul %0, %1, %cst {dimension_numbers = #tpu.dot_dimension_numbers<[1], [0], [0], [1], [0, 0, 1, 1], [], []>} : vector<16x64xbf16>, vector<64x64xbf16>, vector<16x64xf32> -> vector<16x64xf32>
    %c0_3 = arith.constant 0 : index
    %c0_4 = arith.constant 0 : index
    %3 = vector.load %arg3[%c0_3, %c0_4] : memref<1x64xf32, #tpu.memory_space<vmem>>, vector<1x64xf32>
    %4 = vector.broadcast %3 : vector<1x64xf32> to vector<16x64xf32>
    %5 = arith.mulf %2, %4 : vector<16x64xf32>
    %c0_5 = arith.constant 0 : index
    %c0_6 = arith.constant 0 : index
    %6 = vector.load %arg4[%c0_5, %c0_6] : memref<1x64xf32, #tpu.memory_space<vmem>>, vector<1x64xf32>
    %7 = vector.broadcast %6 : vector<1x64xf32> to vector<16x64xf32>
    %8 = arith.addf %5, %7 : vector<16x64xf32>
    %cst_7 = arith.constant 0.000000e+00 : f32
    %9 = vector.broadcast %cst_7 : f32 to vector<16x64xf32>
    %10 = arith.maximumf %8, %9 : vector<16x64xf32>
    %c0_8 = arith.constant 0 : index
    %c0_9 = arith.constant 0 : index
    %11 = vector.load %arg5[%c0_8, %c0_9] : memref<16x64xf32, #tpu.memory_space<vmem>>, vector<16x64xf32>
    tpu.vector_store %arg5[%c0_8, %c0_9], %10 {strides = array<i32>} : memref<16x64xf32, #tpu.memory_space<vmem>>, vector<16x64xf32>,
    return
  }
  func.func @transform_0(%arg0: i32) -> (i32, i32) {
    %c0_i32 = arith.constant 0 : i32
    %c0_i32_0 = arith.constant 0 : i32
    return %arg0, %c0_i32 : i32, i32
  }
  func.func @transform_1(%arg0: i32) -> (i32, i32) {
    %c0_i32 = arith.constant 0 : i32
    %c0_i32_0 = arith.constant 0 : i32
    %c0_i32_1 = arith.constant 0 : i32
    return %c0_i32, %c0_i32_0 : i32, i32
  }
  func.func @transform_2(%arg0: i32) -> (i32, i32) {
    %c0_i32 = arith.constant 0 : i32
    %c0_i32_0 = arith.constant 0 : i32
    %c0_i32_1 = arith.constant 0 : i32
    return %c0_i32, %c0_i32_0 : i32, i32
  }
  func.func @transform_3(%arg0: i32) -> (i32, i32) {
    %c0_i32 = arith.constant 0 : i32
    %c0_i32_0 = arith.constant 0 : i32
    %c0_i32_1 = arith.constant 0 : i32
    return %c0_i32, %c0_i32_0 : i32, i32
  }
  func.func @transform_4(%arg0: i32) -> (i32, i32) {
    %c0_i32 = arith.constant 0 : i32
    %c0_i32_0 = arith.constant 0 : i32
    return %arg0, %c0_i32 : i32, i32
  }
}

</mosaic_0001>

<bundles_post_ra>
// kernel: tpu_custom_call.1
= control target key start
LH: loop header
LB: loop body
LE: loop exit
PB: predicated region body
PF: predicated region fallthrough
CT: control target
= control target key end

     0   :  { %9 = vsyncpa [#allocation3], 0  ;;  %s929_s0 = inlined_call_operand.hbm [shape: bf16[32,64], index: 0, kind: input, shape index: {}]   ;;  %s930_s1 = inlined_call_operand.hbm [shape: bf16[64,64], index: 1, kind: input, shape index: {}]   ;;  %s931_s2 = inlined_call_operand.vmem [shape: f32[1,64], index: 2, kind: input, shape index: {}]   ;;  %s932_s3 = inlined_call_operand.vmem [shape: f32[1,64], index: 3, kind: input, shape index: {}]   ;;  %s933_s4 = inlined_call_operand.hbm [shape: f32[32,64], index: 4, kind: output, shape index: {}]  }
   0x1   :  { %11 = vsyncpa [#allocation3 + $0x1], 0 }
   0x2   :  { %12 = vsyncpa [#allocation6], 0 }
   0x3   :  { %13 = vsyncpa [#allocation4], 0 }
   0x4   :  { %15 = vsyncpa [#allocation4 + $0x1], 0  ;;  %s712_s15 = smov 0   ;;  %s714_s16 = smov 0  }
   0x5   :  { %s716_s17 = smov 0   ;;  %s718_s18 = smov 0  }
   0x6 LB: > { %s733_s19 = sadd.s32 4294967295, %s676_s18   ;;  %s437_s20 = sadd.s32 4294967294, %s676_s18   ;;  %s676_s18 = sphi %s718_s18, %s953_s18   ;;  %s672_s17 = sphi %s716_s17, %s952_s17   ;;  %s668_s16 = sphi %s714_s16, %s951_s16   ;;  %s664_s15 = sphi %s712_s15, %s950_s15  }
   0x7   : > { %p41_p0 = scmp.ne.s32.totalorder %s668_s16, %s664_s15  ;;  %p934_p1 = scmp.eq.s32.totalorder %s733_s19, 0 }
   0x8   : > { %p134_p3 = scmp.eq.s32.totalorder %s437_s20, 1  ;;  %p438_p5 = scmp.ge.s32.totalorder %s676_s18, 1 }
   0x9   : > { %p742_p4 = por %p934_p1, %p41_p0  ;;  %p141_p7 = scmp.lt.s32.totalorder %s676_s18, 3 }
   0xa   : > { %p747_p6 = por %p134_p3, %p41_p0  ;;  %s678_s24 = smov [#allocation5]  }
   0xb   : > { %s937_s21 = scalar_select %p742_p4, 1, 0 }
   0xc   : > { %s938_s22 = scalar_select %p747_p6, 1, 0 }
   0xd   : > { %p752_p8 = pnand %p438_p5, %p141_p7  ;;  %s153_s25 = sshll.u32 %s678_s24, 4  ;;  %s756_s25 = int_to_ptr.vmem [resolvable:$true] %s153_s25 }
   0xe   : > { %s768_s27 = sadd.s32 1, %s676_s18   ;;  %s28_s28 = sadd.s32 1, %s672_s17 }
   0xf   : > { %s939_s23 = scalar_select %p752_p8, 1, 0 }
  0x10   : > { %p488_p9 = pneg %p752_p8  ;;  %s25_s29 = ssub.s32 %s676_s18, %s768_s27 }
  0x11   : > { %s548_s6 = scalar_lea.hbm %s930_s1, 512 }
  0x12   : > { %p763_p11 = pnand %p488_p9, %p934_p1  ;;  %p549_p12 = scmp.ne.s32.totalorder %s930_s1, %s548_s6 }
  0x13   : > { %p555_p5 = scmp.lt.u32.totalorder %s548_s6, %s930_s1 }
  0x14   : > { %p550_p13 = pneg %p763_p11 }
  0x16   : > { %p551_p0 = pnand %p550_p13, %p549_p12 }
  0x18   : > { %p552_p3 = pneg %p551_p0 }
  0x1a   : > { %p557_p7 = pnand %p555_p5, %p552_p3 }
  0x1c   : > { %560 = shalt.err (!%p557_p7)
}
  0x1d   : > { %s561_s11 = scalar_lea.vmem %s756_s25, 512  ;;  %p569_p2 = scmp.lt.s32.totalorder %s756_s25, %s756_s25 }
  0x1e   : > { %p562_p9 = scmp.ne.s32.totalorder %s756_s25, %s561_s11  ;;  %p570_p6 = scmp.lt.s32.totalorder %s561_s11, %s561_s11 }
  0x20   : > { %p564_p10 = pnand %p562_p9, %p550_p13  ;;  %p571_p4 = por %p570_p6, %p569_p2 }
  0x22   : > { %p565_p1 = pneg %p564_p10 }
  0x24   : > { %p572_p8 = pnand %p571_p4, %p565_p1 }
  0x26   : > { %575 = shalt.err (!%p572_p8)
}
  0x27   : > { %s679_s12 = smov 64   ;;  %s680_s13 = smov 4  }
  0x28   : > { %491 = dma.hbm_to_vmem [thread:$0]  (!%p763_p11), %s930_s1, 512, %s756_s25, [#allocation6], %s679_s12, %s679_s12, %s680_s13  }
  0x29   : > { %p26_p1 = scmp.eq.s32.totalorder %s25_s29, 0  ;;  %p35_p2 = scmp.ne.s32.totalorder %s672_s17, %s668_s16 }
  0x2a   : > { %p36_p4 = scmp.eq.s32.totalorder %s676_s18, 0  ;;  %p501_p6 = scmp.lt.s32.totalorder %s676_s18, 2 }
  0x2b   : > { %s802_s24 = scalar_select %p26_p1, %s672_s17, %s28_s28  }
  0x2c   : > { %p37_p8 = por %p36_p4, %p35_p2  ;;  %p941_p10 = scmp.eq.s32.totalorder %s733_s19, 1 }
  0x2d   : > { %s173_s26 = sand.u32 1, %s672_s17   ;;  %s461_s5 = sshll.u32 %s676_s18, 7 }
  0x2e   : > { %p806_p12 = por %p941_p10, %p35_p2  ;;  %s441_s6 = sshll.u32 %s173_s26, 3 }
  0x2f   : > { %s815_s9 = scalar_lea.hbm %s929_s0, %s461_s5  ;;  %s177_s25 = scalar_lea.vmem [#allocation2], %s441_s6 }
  0x30   : > { %s184_s28 = sshll.u32 %s177_s25, 4  ;;  %p817_p11 = pnand %p501_p6, %p37_p8  ;;  %s821_s28 = int_to_ptr.vmem [resolvable:$true] %s184_s28 }
  0x31   : > { %s823_s10 = scalar_lea.sflag [#allocation3], %s173_s26  ;;  %s576_s11 = scalar_lea.hbm %s815_s9, 128 }
  0x32   : > { %p577_p13 = scmp.ne.s32.totalorder %s815_s9, %s576_s11  ;;  %p578_p0 = pneg %p817_p11 }
  0x33   : > { %s581_s5 = scalar_lea.hbm %s929_s0, 256  ;;  %p582_p7 = scmp.lt.u32.totalorder %s815_s9, %s929_s0 }
  0x34   : > { %p579_p3 = pnand %p578_p0, %p577_p13  ;;  %p583_p9 = scmp.lt.u32.totalorder %s581_s5, %s576_s11 }
  0x35   : > { %p585_p2 = scmp.lt.u32.totalorder %s576_s11, %s815_s9 }
  0x36   : > { %p580_p5 = pneg %p579_p3  ;;  %p584_p1 = por %p583_p9, %p582_p7 }
  0x38   : > { %p586_p4 = por %p585_p2, %p584_p1 }
  0x3a   : > { %p587_p6 = pnand %p586_p4, %p580_p5 }
  0x3c   : > { %590 = shalt.err (!%p587_p6)
}
  0x3d   : > { %s591_s26 = scalar_lea.vmem %s821_s28, 128  ;;  %s681_s8 = smov [#allocation2]  }
  0x3e   : > { %p592_p8 = scmp.ne.s32.totalorder %s821_s28, %s591_s26  ;;  %s596_s25 = sshll.u32 %s681_s8, 4  ;;  %s597_s25 = int_to_ptr.vmem [resolvable:$false] %s596_s25 }
  0x3f   : > { %s598_s14 = scalar_lea.vmem %s597_s25, 256  ;;  %p599_p3 = scmp.lt.s32.totalorder %s821_s28, %s597_s25 }
  0x40   : > { %p594_p10 = pnand %p592_p8, %p578_p0  ;;  %p600_p7 = scmp.lt.s32.totalorder %s598_s14, %s591_s26 }
  0x42   : > { %p595_p13 = pneg %p594_p10  ;;  %p601_p9 = por %p600_p7, %p599_p3 }
  0x44   : > { %p602_p1 = pnand %p601_p9, %p595_p13 }
  0x46   : > { %605 = shalt.err (!%p602_p1)
}
  0x47   : > { %495 = dma.hbm_to_vmem [thread:$0]  (!%p817_p11), %s815_s9, 128, %s821_s28, %s823_s10, %s679_s12, %s679_s12, %s680_s13  }
  0x48   : > { %p944_p0 = scmp.ne.s32.totalorder %s939_s23, 0 }
  0x49   : > { %s857_s11 = sand.u32 (!%p944_p0), 1, %s668_s16   ;;  %p945_p5 = scmp.ne.s32.totalorder (!%p944_p0), %s937_s21, 0 }
  0x4a   : > { %196 = sbr.rel (%p944_p0) target bundleno = 337 (0x151), region = 36  ;;  %s445_s20 = sshll.u32 (!%p944_p0), %s857_s11, 3 }
  0x4b   : > { %s199_s5 = scalar_lea.sflag (!%p944_p0), [#allocation3], %s857_s11  ;;  %s202_s6 = scalar_lea.vmem (!%p944_p0), [#allocation2], %s445_s20 }
  0x51   : > { %651 = dma.done.wait (%p945_p5), %s199_s5, 128  }
  0x52   : > { %653 = vsyncadd (%p945_p5), %s199_s5, 4294967168  ;;  %p946_p2 = scmp.eq.s32.totalorder %s733_s19, 0 }
  0x54   : > { %655 = dma.done.wait (%p946_p2), [#allocation6], 512   ;;  %p947_p11 = pmov %p946_p2 }
  0x55   : > { %v682_v0 = vmov 0.0   ;;  %vm683_vm0 = vmmov 0   ;;  %v543_v1 = vld [vmem:[#allocation5] sm:$0xff]   ;;  %v544_v2 = vld [vmem:[#allocation5 + $0x8] sm:$0xff]   ;;  %v545_v3 = vld [vmem:[#allocation5 + $0x10] sm:$0xff]   ;;  %vm273_vm1 = vcmask 523264  }
  0x56   : > { %657 = vsyncadd (%p947_p11), [#allocation6], 4294966784  ;;  %468 = vmatprep.subr.bf16.mxu0 %v682_v0  ;;  %476 = vmatprep.mubr.msk.bf16.mxu0 %vm683_vm0, %v682_v0  ;;  %v546_v4 = vld [vmem:[#allocation5 + $0x18] sm:$0xff]   ;;  %s447_s21 = sshll.u32 %s857_s11, 4  ;;  %v454_v6 = vld [vmem:[%s931_s2] ss:$0 sm:$0xff] }
  0x57   : > { %469 = vmatpush3.bf16.msra.mxu0 %v543_v1  ;;  %v547_v5 = vld [vmem:[%s202_s6] sm:$0xff]   ;;  %s462_s28 = sshll.u32 %s733_s19, 8  ;;  %s230_s29 = scalar_lea.vmem [#allocation7], %s447_s21 }
  0x58   : > { %470 = vmatprep.subr.bf16.mxu0 %v682_v0  ;;  %v455_v8 = vld [vmem:[%s932_s3] ss:$0 sm:$0xff]  ;;  %s354_s10 = sshll.u32 %s230_s29, 4  ;;  %s881_s8 = scalar_lea.hbm %s933_s4, %s462_s28  ;;  %s883_s10 = int_to_ptr.vmem [resolvable:$true] %s354_s10 }
  0x59   : > { %s341_s19 = scalar_lea.sflag [#allocation4], %s857_s11  ;;  %s606_s25 = scalar_lea.vmem %s883_s10, 256 }
  0x5a   : > { %p607_p4 = scmp.ne.s32.totalorder %s883_s10, %s606_s25  ;;  %s684_s14 = smov [#allocation7]  }
  0x5b   : > { %471 = vmatpush3.bf16.msra.mxu0 %v544_v2  ;;  %s610_s20 = sshll.u32 %s684_s14, 4  ;;  %s611_s20 = int_to_ptr.vmem [resolvable:$false] %s610_s20 }
  0x5c   : > { %472 = vmatprep.subr.bf16.mxu0 %v682_v0  ;;  %p608_p6 = pnand %p607_p4, %p806_p12  ;;  %s612_s5 = scalar_lea.vmem %s611_s20, 512 }
  0x5d   : > { %p613_p10 = scmp.lt.s32.totalorder %s883_s10, %s611_s20  ;;  %p614_p13 = scmp.lt.s32.totalorder %s612_s5, %s606_s25 }
  0x5e   : > { %p609_p8 = pneg %p608_p6 }
  0x5f   : > { %473 = vmatpush3.bf16.msra.mxu0 %v545_v3  ;;  %p615_p3 = por %p614_p13, %p613_p10 }
  0x60   : > { %474 = vmatprep.subr.bf16.mxu0 %v682_v0 }
  0x61   : > { %p616_p7 = pnand %p615_p3, %p609_p8 }
  0x63   : > { %475 = vmatpush3.bf16.msra.mxu0 %v546_v4 }
  0x66   : > { %477 = vmatmul.mubr.msk.bf16.vlgmr.msra.gmra.mrb[0].mxu0 %vm273_vm1, %v547_v5 }
 0x139   : > { %v311_v7 = vpop.f32.mrb[0].mxu0 }
 0x13a   : > { %v325_v9 = vmul.f32 %v454_v6, %v311_v7  ;;  %v478_v10 = vpop.f32.mrb[1].mxu0 }
 0x13b   : > { %v314_v11 = vpop.f32.mrb[2].mxu0 }
 0x13c   : > { %v334_v12 = vadd.f32 %v455_v8, %v325_v9  ;;  %v326_v13 = vmul.f32 %v454_v6, %v314_v11  ;;  %v479_v14 = vpop.f32.mrb[3].mxu0 }
 0x13e   : > { %v336_v15 = vmax.f32 %v334_v12, 0.0  ;;  %v335_v16 = vadd.f32 %v455_v8, %v326_v13 }
 0x140   : > { %338 = vst.msk [vmem:[%s230_s29] sm:$0xff] %vm273_vm1, %v336_v15  ;;  %v337_v17 = vmax.f32 %v335_v16, 0.0 }
 0x142   : > { %339 = vst.msk [vmem:[%s230_s29 + $0x8] sm:$0xff] %vm273_vm1, %v337_v17 }
 0x143   : > { %619 = shalt.err (!%p616_p7)
}
 0x144   : > { %s620_s6 = scalar_lea.hbm %s881_s8, 256  ;;  %s624_s12 = scalar_lea.hbm %s933_s4, 512 }
 0x145   : > { %p621_p9 = scmp.ne.s32.totalorder %s881_s8, %s620_s6  ;;  %p625_p5 = scmp.lt.u32.totalorder %s881_s8, %s933_s4 }
 0x146   : > { %p626_p2 = scmp.lt.u32.totalorder %s624_s12, %s620_s6  ;;  %p628_p4 = scmp.lt.u32.totalorder %s620_s6, %s881_s8 }
 0x147   : > { %p622_p1 = pnand %p621_p9, %p806_p12 }
 0x148   : > { %p627_p11 = por %p626_p2, %p625_p5 }
 0x149   : > { %p623_p0 = pneg %p622_p1 }
 0x14a   : > { %p629_p6 = por %p628_p4, %p627_p11 }
 0x14c   : > { %p630_p8 = pnand %p629_p6, %p623_p0 }
 0x14e   : > { %633 = shalt.err (!%p630_p8)
}
 0x14f   : > { %s685_s28 = smov 128   ;;  %s686_s29 = smov 8  }
 0x150   : > { %486 = dma.vmem_to_hbm [thread:$0]  (%p806_p12), %s883_s10, 256, %s881_s8, %s341_s19, %s685_s28, %s685_s28, %s686_s29  }
 0x151 PF: > { %s369_s7 = sand.u32 1, %s664_s15   ;;  %p948_p10 = scmp.ne.s32.totalorder %s938_s22, 0 }
 0x152   : > { %p949_p13 = scmp.ge.s32.totalorder %s676_s18, 2  ;;  %s370_s26 = scalar_lea.sflag [#allocation4], %s369_s7 }
 0x154   : > { %p497_p3 = pnand %p949_p13, %p948_p10 }
 0x156   : > { %659 = dma.done.wait (!%p497_p3), %s370_s26, 256  }
 0x157   : > { %661 = vsyncadd (!%p497_p3), %s370_s26, 4294967040  ;;  %p18_p7 = scmp.ge.s32.totalorder %s768_s27, 4   ;;  %s950_s15 = smov %s668_s16 }
 0x158   : > { %s951_s16 = smov %s672_s17  ;;  %s952_s17 = smov %s802_s24 }
 0x159   : > { %s953_s18 = smov %s768_s27  ;;  %20 = sbr.rel (!%p18_p7) target bundleno = 6 (0x6), region = 85 }
 0x160   :  { %375 = vsyncpa [#allocation3], 1 }
 0x161   :  { %377 = vsyncpa [#allocation3 + $0x1], 1 }
 0x162   :  { %378 = vsyncpa [#allocation6], 1 }
 0x163   :  { %379 = vsyncpa [#allocation4], 1 }
 0x164   :  { %381 = vsyncpa [#allocation4 + $0x1], 1 }

</bundles_post_ra>
